<compile_context>
chip_gen: v5e
topology: v5e:2x2
jax: 0.10.0
libtpu: 0.0.40
codegen_flags: <defaults>
</compile_context>

<pallas_src>
import jax
import jax.numpy as jnp
import numpy as np
from jax.experimental import pallas as pl
from jax.experimental.pallas import tpu as pltpu

SUBLANE_BF16 = 16   # bf16 sublane packing granularity
MAX_TILE_B = 512    # batch rows per grid step (well under VMEM on all chips)


def _round_up(n, m):
    return ((n + m - 1) // m) * m


def ensemble_kernel(x_ref, w1_ref, b1_ref, w2_ref, b2_ref, o_ref):
    # Cast the activation to bf16 in-kernel (VPU slot is idle-ish here).
    x = x_ref[...].astype(jnp.bfloat16)
    # h = relu(x @ W1 + b1): bf16 MXU operands, f32 accumulate, f32 pointwise.
    h = jnp.dot(x, w1_ref[...], preferred_element_type=jnp.float32)
    h = jnp.maximum(h + b1_ref[...], 0.0)
    # out1' = h @ (a*W2) + a*b2   (the ensemble scalar a=2.2 is pre-folded).
    y = jnp.dot(h.astype(jnp.bfloat16), w2_ref[...],
                preferred_element_type=jnp.float32)
    o_ref[...] = (y + b2_ref[...]).astype(o_ref.dtype)


def prep_params(w1, b1, w2, b2, a_scalar):
    """One-time prep: fold a into the 2nd layer, cast MXU operands to bf16."""
    a = jnp.asarray(a_scalar, jnp.float32).reshape(())
    w1_p = w1.astype(jnp.bfloat16)
    b1_p = b1.astype(jnp.float32).reshape(1, -1)
    w2_p = (w2.astype(jnp.float32) * a).astype(jnp.bfloat16)
    b2_p = (b2.astype(jnp.float32) * a).reshape(1, -1)
    return w1_p, b1_p, w2_p, b2_p


@jax.jit
def my_ensemble(x, w1_p, b1_p, w2_p, b2_p):
    B, Din = x.shape
    H = w1_p.shape[1]
    Dout = w2_p.shape[1]

    # Batch tiling: big tiles (per-step overhead amortization), multiple of 16
    # for bf16 sublane packing.  Weights stay VMEM-resident across steps.
    tile_b = min(MAX_TILE_B, _round_up(B, SUBLANE_BF16))
    B_p = _round_up(B, tile_b)

    # Row-pad only (no lane pad, no wrapper cast); no-op when B is aligned.
    x_p = jnp.pad(x, ((0, B_p - B), (0, 0))) if B_p != B else x

    grid = (B_p // tile_b,)

    flops = 2 * B_p * (Din * H + H * Dout)
    bytes_accessed = (x_p.size * 4 + w1_p.size * 2 + w2_p.size * 2
                      + b1_p.size * 4 + b2_p.size * 4 + B_p * Dout * 4)

    out_p = pl.pallas_call(
        ensemble_kernel,
        out_shape=jax.ShapeDtypeStruct((B_p, Dout), jnp.float32),
        grid=grid,
        in_specs=[
            pl.BlockSpec((tile_b, Din), lambda i: (i, 0)),  # x: tiled over batch
            pl.BlockSpec((Din, H), lambda i: (0, 0)),       # W1: resident
            pl.BlockSpec((1, H), lambda i: (0, 0)),         # b1: resident
            pl.BlockSpec((H, Dout), lambda i: (0, 0)),      # W2 (pre-scaled)
            pl.BlockSpec((1, Dout), lambda i: (0, 0)),      # b2 (pre-scaled)
        ],
        out_specs=pl.BlockSpec((tile_b, Dout), lambda i: (i, 0)),
        compiler_params=pltpu.CompilerParams(
            dimension_semantics=("parallel",)),
        cost_estimate=pl.CostEstimate(flops=flops, transcendentals=0,
                                      bytes_accessed=bytes_accessed),
    )(x_p, w1_p, b1_p, w2_p, b2_p)

    # Un-pad rows (columns are already unpadded).  Identity when B == B_p.
    return out_p[:B]


def my_ensemble_ref(x, w1, b1, w2, b2, a_scalar):
    # Pure f32 reference of the original module semantics.
    h = jnp.maximum(x @ w1 + b1, 0.0)
    out1 = h @ w2 + b2
    return out1 * a_scalar[0, 0]


if __name__ == "__main__":
    # Small shapes consistent with the forward pass.
    B, Din, H, Dout = 8, 32, 64, 32

    key = jax.random.PRNGKey(0)
    kx, k1, kb1, k2, kb2 = jax.random.split(key, 5)

    x  = jax.random.normal(kx, (B, Din), dtype=jnp.float32)
    w1 = jax.random.normal(k1, (Din, H), dtype=jnp.float32) * 0.1
    b1 = jax.random.normal(kb1, (1, H), dtype=jnp.float32) * 0.1
    w2 = jax.random.normal(k2, (H, Dout), dtype=jnp.float32) * 0.1
    b2 = jax.random.normal(kb2, (1, Dout), dtype=jnp.float32) * 0.1
    a  = jnp.array([[2.2]], dtype=jnp.float32)  # self.a = FloatTensor([2.2])

    w1_p, b1_p, w2_p, b2_p = prep_params(w1, b1, w2, b2, a)

    out = my_ensemble(x, w1_p, b1_p, w2_p, b2_p)
    out = jax.block_until_ready(out)

    ref = my_ensemble_ref(x, w1, b1, w2, b2, a)
    # Tolerance accommodates bf16 MXU operands (f32 accumulation).
    np.testing.assert_allclose(np.asarray(out), np.asarray(ref),
                               rtol=2e-2, atol=2e-2)

    print("KERNEL_OK")
</pallas_src>

<mosaic_0001>
module attributes {stable_mosaic.version = 11 : i64} {
  func.func @ensemble_kernel(%arg0: i32, %arg1: memref<16x32xf32, #tpu.memory_space<vmem>>, %arg2: memref<32x64xbf16, #tpu.memory_space<vmem>>, %arg3: memref<1x64xf32, #tpu.memory_space<vmem>>, %arg4: memref<64x32xbf16, #tpu.memory_space<vmem>>, %arg5: memref<1x32xf32, #tpu.memory_space<vmem>>, %arg6: memref<16x32xf32, #tpu.memory_space<vmem>>) attributes {dimension_semantics = [#tpu.dimension_semantics<parallel>], iteration_bounds = array<i64: 1>, scalar_prefetch = 0 : i64, scratch_operands = 0 : i64, tpu.core_type = #tpu.core_type<tc>, window_params = [{transform_indices = @transform_0, window_bounds = array<i64: 16, 32>}, {pipeline_mode = #tpu.pipeline_mode<synchronous>, transform_indices = @transform_1, window_bounds = array<i64: 32, 64>}, {pipeline_mode = #tpu.pipeline_mode<synchronous>, transform_indices = @transform_2, window_bounds = array<i64: 1, 64>}, {pipeline_mode = #tpu.pipeline_mode<synchronous>, transform_indices = @transform_3, window_bounds = array<i64: 64, 32>}, {pipeline_mode = #tpu.pipeline_mode<synchronous>, transform_indices = @transform_4, window_bounds = array<i64: 1, 32>}, {transform_indices = @transform_5, window_bounds = array<i64: 16, 32>}]} {
    %c0 = arith.constant 0 : index
    %c0_0 = arith.constant 0 : index
    %0 = vector.load %arg1[%c0, %c0_0] : memref<16x32xf32, #tpu.memory_space<vmem>>, vector<16x32xf32>
    %1 = arith.truncf %0 : vector<16x32xf32> to vector<16x32xbf16>
    %c0_1 = arith.constant 0 : index
    %c0_2 = arith.constant 0 : index
    %2 = vector.load %arg2[%c0_1, %c0_2] : memref<32x64xbf16, #tpu.memory_space<vmem>>, vector<32x64xbf16>
    %cst = arith.constant dense<0.000000e+00> : vector<16x64xf32>
    %3 = tpu.matmul %1, %2, %cst {dimension_numbers = #tpu.dot_dimension_numbers<[1], [0], [0], [1], [0, 0, 1, 1], [], []>} : vector<16x32xbf16>, vector<32x64xbf16>, vector<16x64xf32> -> vector<16x64xf32>
    %c0_3 = arith.constant 0 : index
    %c0_4 = arith.constant 0 : index
    %4 = vector.load %arg3[%c0_3, %c0_4] : memref<1x64xf32, #tpu.memory_space<vmem>>, vector<1x64xf32>
    %5 = vector.broadcast %4 : vector<1x64xf32> to vector<16x64xf32>
    %6 = arith.addf %3, %5 : vector<16x64xf32>
    %cst_5 = arith.constant 0.000000e+00 : f32
    %7 = vector.broadcast %cst_5 : f32 to vector<16x64xf32>
    %8 = arith.maximumf %6, %7 : vector<16x64xf32>
    %9 = arith.truncf %8 : vector<16x64xf32> to vector<16x64xbf16>
    %c0_6 = arith.constant 0 : index
    %c0_7 = arith.constant 0 : index
    %10 = vector.load %arg4[%c0_6, %c0_7] : memref<64x32xbf16, #tpu.memory_space<vmem>>, vector<64x32xbf16>
    %cst_8 = arith.constant dense<0.000000e+00> : vector<16x32xf32>
    %11 = tpu.matmul %9, %10, %cst_8 {dimension_numbers = #tpu.dot_dimension_numbers<[1], [0], [0], [1], [0, 0, 1, 1], [], []>} : vector<16x64xbf16>, vector<64x32xbf16>, vector<16x32xf32> -> vector<16x32xf32>
    %c0_9 = arith.constant 0 : index
    %c0_10 = arith.constant 0 : index
    %12 = vector.load %arg5[%c0_9, %c0_10] : memref<1x32xf32, #tpu.memory_space<vmem>>, vector<1x32xf32>
    %13 = vector.broadcast %12 : vector<1x32xf32> to vector<16x32xf32>
    %14 = arith.addf %11, %13 : vector<16x32xf32>
    %c0_11 = arith.constant 0 : index
    %c0_12 = arith.constant 0 : index
    %15 = vector.load %arg6[%c0_11, %c0_12] : memref<16x32xf32, #tpu.memory_space<vmem>>, vector<16x32xf32>
    tpu.vector_store %arg6[%c0_11, %c0_12], %14 {strides = array<i32>} : memref<16x32xf32, #tpu.memory_space<vmem>>, vector<16x32xf32>,
    return
  }
  func.func @transform_0(%arg0: i32) -> (i32, i32) {
    %c0_i32 = arith.constant 0 : i32
    %c0_i32_0 = arith.constant 0 : i32
    return %arg0, %c0_i32 : i32, i32
  }
  func.func @transform_1(%arg0: i32) -> (i32, i32) {
    %c0_i32 = arith.constant 0 : i32
    %c0_i32_0 = arith.constant 0 : i32
    %c0_i32_1 = arith.constant 0 : i32
    return %c0_i32, %c0_i32_0 : i32, i32
  }
  func.func @transform_2(%arg0: i32) -> (i32, i32) {
    %c0_i32 = arith.constant 0 : i32
    %c0_i32_0 = arith.constant 0 : i32
    %c0_i32_1 = arith.constant 0 : i32
    return %c0_i32, %c0_i32_0 : i32, i32
  }
  func.func @transform_3(%arg0: i32) -> (i32, i32) {
    %c0_i32 = arith.constant 0 : i32
    %c0_i32_0 = arith.constant 0 : i32
    %c0_i32_1 = arith.constant 0 : i32
    return %c0_i32, %c0_i32_0 : i32, i32
  }
  func.func @transform_4(%arg0: i32) -> (i32, i32) {
    %c0_i32 = arith.constant 0 : i32
    %c0_i32_0 = arith.constant 0 : i32
    %c0_i32_1 = arith.constant 0 : i32
    return %c0_i32, %c0_i32_0 : i32, i32
  }
  func.func @transform_5(%arg0: i32) -> (i32, i32) {
    %c0_i32 = arith.constant 0 : i32
    %c0_i32_0 = arith.constant 0 : i32
    return %arg0, %c0_i32 : i32, i32
  }
}

</mosaic_0001>

<bundles_post_ra>
// kernel: my_ensemble.1
= control target key start
LH: loop header
LB: loop body
LE: loop exit
PB: predicated region body
PF: predicated region fallthrough
CT: control target
= control target key end

     0   :  { %vm44_vm0 = vcmask 261120   ;;  %vm101_vm1 = vcmask 523264   ;;  %s228_s1 = inlined_call_operand.vmem [shape: bf16[32,64], index: 1, kind: input, shape index: {}]   ;;  %s229_s0 = inlined_call_operand.vmem [shape: f32[16,32], index: 0, kind: input, shape index: {}]   ;;  %s230_s2 = inlined_call_operand.vmem [shape: f32[1,64], index: 2, kind: input, shape index: {}]   ;;  %s231_s4 = inlined_call_operand.vmem [shape: f32[1,32], index: 4, kind: input, shape index: {}]   ;;  %s232_s3 = inlined_call_operand.vmem [shape: bf16[64,32], index: 3, kind: input, shape index: {}]   ;;  %s233_s5 = inlined_call_operand.vmem [shape: f32[16,32], index: 5, kind: output, shape index: {}]  }
   0x1   :  { %v152_v0 = vld [vmem:[%s228_s1 + $0x8] sm:$0xff]  ;;  %v151_v1 = vld [vmem:[%s228_s1] sm:$0xff]  ;;  %v156_v5 = vld [vmem:[%s232_s3 + $0x18] sm:$0xff] }
   0x2   :  { %54 = vmatpush.bf16.msra.mxu0 %v152_v0  ;;  %v21_v2 = vld [vmem:[%s229_s0] sm:$0xff]  ;;  %v22_v3 = vld [vmem:[%s229_s0 + $0x8] sm:$0xff]  ;;  %109 = vmatpush.bf16.msra.mxu1 %v156_v5  ;;  %v155_v6 = vld [vmem:[%s232_s3 + $0x10] sm:$0xff] }
   0x3   :  { %v23_v4 = vpack.c.bf16 %v22_v3, %v21_v2  ;;  %v154_v7 = vld [vmem:[%s232_s3 + $0x8] sm:$0xff]  ;;  %v153_v8 = vld [vmem:[%s232_s3] sm:$0xff] }
   0x4   :  { %v157_v10 = vld [vmem:[%s230_s2] ss:$0 sm:$0xff] }
   0x5   :  { %v158_v17 = vld [vmem:[%s231_s4] ss:$0 sm:$0xff] }
   0x6   :  { %55 = vmatpush.bf16.msra.mxu0 %v151_v1  ;;  %110 = vmatpush.bf16.msra.mxu1 %v155_v6 }
   0x9   :  { %133 = vmatmul.msk.bf16.vlgmr.msra.gmra.mxu0 %vm44_vm0, %v23_v4 }
   0xa   :  { %111 = vmatpush.bf16.msra.mxu1 %v154_v7 }
   0xe   :  { %112 = vmatpush.bf16.msra.mxu1 %v153_v8 }
  0x86   :  { %v57_v9 = vpop.f32.mrf.mxu0 }
  0x87   :  { %v58_v11 = vadd.f32 %v157_v10, %v57_v9 }
  0x89   :  { %v62_v14 = vmax.f32 %v58_v11, 0.0 }
  0x8e   :  { %v59_v12 = vpop.f32.mrf.mxu0 }
  0x8f   :  { %v60_v13 = vadd.f32 %v157_v10, %v59_v12 }
  0x91   :  { %v63_v15 = vmax.f32 %v60_v13, 0.0 }
  0x93   :  { %v64_v16 = vpack.c.bf16 %v63_v15, %v62_v14 }
  0x95   :  { %150 = vmatmul.msk.bf16.vlgmr.msra.gmra.mxu1 %vm101_vm1, %v64_v16 }
 0x112   :  { %v114_v18 = vpop.f32.mrf.mxu1 }
 0x113   :  { %v115_v19 = vadd.f32 %v158_v17, %v114_v18 }
 0x115   :  { %119 = vst.msk [vmem:[%s233_s5] sm:$0xff] %vm44_vm0, %v115_v19 }
 0x11a   :  { %v116_v20 = vpop.f32.mrf.mxu1 }
 0x11b   :  { %v117_v21 = vadd.f32 %v158_v17, %v116_v20 }
 0x11d   :  { %120 = vst.msk [vmem:[%s233_s5 + $0x8] sm:$0xff] %vm44_vm0, %v117_v21 }

</bundles_post_ra>
